<compile_context>
chip_gen: v6e
topology: v6e:2x2x1
jax: 0.10.0
libtpu: 0.0.40
codegen_flags: <defaults>
</compile_context>

<pallas_src>
import numpy as np
import jax
import jax.numpy as jnp
from jax.experimental import pallas as pl
from jax.experimental.pallas import tpu as pltpu

# ---- hyper-params (final spatial size must be 4: Linear(out_channels * 4, 1)) ----
OUT_CHANNELS = 8        # out_channels
KERNEL_SIZE = 3         # Conv1 kernel_size
STRIDE = 1              # stride (both convs)
DILATION = 1            # dilation (both convs)
SEQ_LEN = 37            # input length L
BATCH = 2

# derived static sizes (stride=1, dilation=1, no padding)
L1 = SEQ_LEN - KERNEL_SIZE + 1          # after Conv1            -> 35
L2 = (L1 - 5) // 3 + 1                  # after AvgPool1d(5, 3)  -> 11
K2 = 3                                  # Conv2 kernel size
L3 = L2 - K2 + 1                        # after Conv2            -> 9
L4 = (L3 - 3) // 2 + 1                  # after AvgPool1d(3, 2)  -> 4
C = OUT_CHANNELS
BC = BATCH * C                          # batch packed on sublanes (row b*C + c)

# ---- packed-x layout: conv1 tap k pre-shifted into a 128-lane-aligned block ----
LANE = 128
X_COLS = KERNEL_SIZE * LANE             # (BC, 384)

# ---- parameter-slab layout: every field starts on a 128-lane boundary; fields that
#      need different row ranges share a column block at sublane offsets % 8 == 0 ----
SLAB_ROWS = ((max(BC, L1) + 7) // 8) * 8          # 40 (hosts the (L1, .) pooling taps)
COL_W1 = 0 * LANE                                  # rows 0..BC-1, K1 cols : conv1 weight
ROW_B1 = BC                                        # rows BC..2BC-1, col COL_W1 : conv1 bias
COL_B2 = 1 * LANE                                  # rows 0..BC-1, 1 col : conv2 bias
ROW_WLE = BC                                       # rows BC..2BC-1, L3 cols : folded pool2+linear w
COL_W2A = 2 * LANE                                 # rows 0..BC-1 tap0 / rows BC..2BC-1 tap1 (BC,BC)
COL_W2C = 3 * LANE                                 # rows 0..BC-1 tap2 (BC,BC)
ROW_SEL = BC                                       # rows BC..BC+B-1 : per-batch row-sum selector
ROW_BL = ((BC + BATCH + 7) // 8) * 8               # rows ROW_BL..ROW_BL+B-1, col COL_W2C : linear bias
COL_P1 = 4 * LANE                                  # rows 0..L1-1 ; pool1 tap k at COL_P1 + k*LANE
SLAB_COLS = COL_P1 + K2 * LANE                     # 896
assert 2 * BC <= SLAB_ROWS and ROW_BL + BATCH <= SLAB_ROWS


def cnnseq1_kernel(x_ref, slab_ref, out_ref):
    # x_ref:    (BC, K1*128)        tap-shifted, channel-broadcast input
    # slab_ref: (SLAB_ROWS, SLAB_COLS) all constants, lane-aligned fields
    # out_ref:  (BATCH, 1)
    x = x_ref[...]
    slab = slab_ref[...]

    w1 = slab[0:BC, COL_W1:COL_W1 + KERNEL_SIZE]            # (BC, K1)
    b1 = slab[ROW_B1:ROW_B1 + BC, COL_W1:COL_W1 + 1]        # (BC, 1)
    b2 = slab[0:BC, COL_B2:COL_B2 + 1]                      # (BC, 1)
    wle = slab[ROW_WLE:ROW_WLE + BC, COL_B2:COL_B2 + L3]    # (BC, L3)  = tile(wl @ P2^T)
    w2_taps = (slab[0:BC, COL_W2A:COL_W2A + BC],            # (BC, BC) block-diag, tap 0
               slab[BC:2 * BC, COL_W2A:COL_W2A + BC],       # tap 1
               slab[0:BC, COL_W2C:COL_W2C + BC])            # tap 2
    sel = slab[ROW_SEL:ROW_SEL + BATCH, COL_W2C:COL_W2C + BC]   # (B, BC) per-batch selector
    bl = slab[ROW_BL:ROW_BL + BATCH, COL_W2C:COL_W2C + 1]       # (B, 1)  linear bias
    p1t = slab[0:L1, COL_P1:COL_P1 + K2 * LANE]                 # (L1, K2*128) pool1, tap-shifted

    # --- Conv1d(1 -> C) + ReLU: taps pre-shifted to 128-aligned blocks (pure VPU) ---
    a1 = w1[:, 0:1] * x[:, 0:L1]
    for k in range(1, KERNEL_SIZE):
        a1 = a1 + w1[:, k:k + 1] * x[:, k * LANE:k * LANE + L1]
    a1 = jnp.maximum(a1 + b1, 0.0)                          # (BC, L1)

    # --- AvgPool1d(5,3) for all K2 conv2 tap-shifts in ONE matmul (MXU) ---
    q = jnp.dot(a1, p1t, preferred_element_type=jnp.float32)    # (BC, K2*128)

    # --- Conv1d(C -> C, k=3) + ReLU: accumulated per-tap dots, aligned lane slices ---
    a2 = jnp.dot(w2_taps[0], q[:, 0:L3], preferred_element_type=jnp.float32)
    for k in range(1, K2):
        a2 = a2 + jnp.dot(w2_taps[k], q[:, k * LANE:k * LANE + L3],
                          preferred_element_type=jnp.float32)
    a2 = jnp.maximum(a2 + b2, 0.0)                          # (BC, L3)

    # --- AvgPool1d(3,2)+Linear folded into wle; per-batch reduce via selector matmul ---
    m = a2 * wle                                            # (BC, L3)
    zb = jnp.dot(sel, m, preferred_element_type=jnp.float32)    # (B, L3)
    z = jnp.sum(zb, axis=1, keepdims=True) + bl             # (B, 1)

    out_ref[...] = 1.0 / (1.0 + jnp.exp(-z))                # Sigmoid, single store


def pack_params(w1, b1, w2, b2, wl_flat, bl):
    """Pack ALL constants (incl. pooling matrices) into one lane-aligned slab."""
    P1 = np.zeros((L1, L2), np.float32)
    for t in range(L2):
        P1[3 * t:3 * t + 5, t] = 1.0 / 5.0
    P2 = np.zeros((L3, L4), np.float32)
    for t in range(L4):
        P2[2 * t:2 * t + 3, t] = 1.0 / 3.0

    w1 = np.asarray(w1, np.float32).reshape(C, KERNEL_SIZE)
    b1 = np.asarray(b1, np.float32).reshape(C, 1)
    w2 = np.asarray(w2, np.float32).reshape(C, C, K2)
    b2 = np.asarray(b2, np.float32).reshape(C, 1)
    wl2d = np.asarray(wl_flat, np.float32).reshape(C, L4)   # torch flatten(1,-1) order
    bl_s = float(np.asarray(bl).reshape(-1)[0])

    wl_eff = wl2d @ P2.T                                    # fold pool2 + linear -> (C, L3)
    eye_b = np.eye(BATCH, dtype=np.float32)

    slab = np.zeros((SLAB_ROWS, SLAB_COLS), np.float32)
    slab[0:BC, COL_W1:COL_W1 + KERNEL_SIZE] = np.tile(w1, (BATCH, 1))
    slab[ROW_B1:ROW_B1 + BC, COL_W1:COL_W1 + 1] = np.tile(b1, (BATCH, 1))
    slab[0:BC, COL_B2:COL_B2 + 1] = np.tile(b2, (BATCH, 1))
    slab[ROW_WLE:ROW_WLE + BC, COL_B2:COL_B2 + L3] = np.tile(wl_eff, (BATCH, 1))
    slab[0:BC, COL_W2A:COL_W2A + BC] = np.kron(eye_b, w2[:, :, 0])
    slab[BC:2 * BC, COL_W2A:COL_W2A + BC] = np.kron(eye_b, w2[:, :, 1])
    slab[0:BC, COL_W2C:COL_W2C + BC] = np.kron(eye_b, w2[:, :, 2])
    slab[ROW_SEL:ROW_SEL + BATCH, COL_W2C:COL_W2C + BC] = np.kron(
        eye_b, np.ones((1, C), np.float32))                 # per-batch row-sum selector
    slab[ROW_BL:ROW_BL + BATCH, COL_W2C:COL_W2C + 1] = bl_s
    for k in range(K2):
        slab[0:L1, COL_P1 + k * LANE:COL_P1 + k * LANE + L3] = P1[:, k:k + L3]
    return jnp.asarray(slab)


# static gather index for the single wrapper-side x packing step
_TAP_IDX = np.arange(KERNEL_SIZE)[:, None] + np.arange(L1)[None, :]      # (K1, L1)


def _pack_x(x2d):
    """(B, L) -> (BC, K1*128): channel broadcast + conv1 tap shift + pad, one fused step."""
    xt = x2d[:, _TAP_IDX]                                          # (B, K1, L1)
    xt = jnp.pad(xt, ((0, 0), (0, 0), (0, LANE - L1)))             # (B, K1, 128)
    xt = xt.reshape(BATCH, X_COLS)
    return jnp.broadcast_to(xt[:, None, :], (BATCH, C, X_COLS)).reshape(BC, X_COLS)


_COST = pl.CostEstimate(
    flops=2 * (BC * KERNEL_SIZE * L1            # conv1
               + BC * L1 * K2 * LANE            # pool1 (tap-expanded) matmul
               + K2 * BC * BC * L3              # conv2 taps
               + BC * L3 + BATCH * BC * L3),    # tail
    transcendentals=BATCH,
    bytes_accessed=4 * (BC * X_COLS + SLAB_ROWS * SLAB_COLS + BATCH),
)


@jax.jit
def cnnseq1_forward(x2d, slab):
    """x2d: (BATCH, SEQ_LEN) float32; returns (BATCH,) float32."""
    x_packed = _pack_x(x2d)
    out = pl.pallas_call(
        cnnseq1_kernel,
        out_shape=jax.ShapeDtypeStruct((BATCH, 1), jnp.float32),
        # whole operands resident in VMEM (two input DMAs total), no grid / pipeline
        in_specs=[pl.BlockSpec(memory_space=pltpu.MemorySpace.VMEM),
                  pl.BlockSpec(memory_space=pltpu.MemorySpace.VMEM)],
        out_specs=pl.BlockSpec(memory_space=pltpu.MemorySpace.VMEM),
        cost_estimate=_COST,
    )(x_packed, slab)
    return out[:, 0]


def init_params(key):
    ks = jax.random.split(key, 6)

    def u(k, shape, fan_in):
        lim = 1.0 / np.sqrt(fan_in)
        return jax.random.uniform(k, shape, jnp.float32, -lim, lim)

    w1 = u(ks[0], (C, KERNEL_SIZE), 1 * KERNEL_SIZE)    # Conv1 weight (C,1,K) squeezed
    b1 = u(ks[1], (C, 1), 1 * KERNEL_SIZE)              # Conv1 bias
    w2 = u(ks[2], (C, C, K2), C * K2)                   # Conv2 weight (C,C,3)
    b2 = u(ks[3], (C, 1), C * K2)                       # Conv2 bias
    wl_flat = u(ks[4], (C * L4,), C * L4)               # Linear weight (1, C*4) squeezed
    bl = u(ks[5], (1, 1), C * L4)                       # Linear bias
    return w1, b1, w2, b2, wl_flat, bl


def reference_np(x2d, w1, b1, w2, b2, wl_flat, bl):
    """Pure numpy mirror of the PyTorch forward."""
    x = np.asarray(x2d, np.float32)
    w1 = np.asarray(w1); b1 = np.asarray(b1)
    w2 = np.asarray(w2); b2 = np.asarray(b2)
    wl_flat = np.asarray(wl_flat); bl = np.asarray(bl)
    B = x.shape[0]

    a1 = np.zeros((B, C, L1), np.float32)
    for k in range(KERNEL_SIZE):
        a1 += x[:, None, k:k + L1] * w1[None, :, k:k + 1]
    a1 = np.maximum(a1 + b1.reshape(1, C, 1), 0.0)

    p1 = np.zeros((B, C, L2), np.float32)
    for t in range(L2):
        p1[:, :, t] = a1[:, :, 3 * t:3 * t + 5].mean(-1)

    a2 = np.zeros((B, C, L3), np.float32)
    for k in range(K2):
        a2 += np.einsum('bct,dc->bdt', p1[:, :, k:k + L3], w2[:, :, k])
    a2 = np.maximum(a2 + b2.reshape(1, C, 1), 0.0)

    p2 = np.zeros((B, C, L4), np.float32)
    for t in range(L4):
        p2[:, :, t] = a2[:, :, 2 * t:2 * t + 3].mean(-1)

    z = p2.reshape(B, -1) @ wl_flat + float(bl[0, 0])
    return 1.0 / (1.0 + np.exp(-z))


if __name__ == "__main__":
    key = jax.random.PRNGKey(0)
    kx, kp = jax.random.split(key)

    # PyTorch-style NCW input with a single channel
    x = jax.random.normal(kx, (BATCH, 1, SEQ_LEN), jnp.float32)
    x2d = x[:, 0, :]                                   # squeeze channel dim (C_in == 1)

    w1, b1, w2, b2, wl_flat, bl = init_params(kp)
    slab = pack_params(w1, b1, w2, b2, wl_flat, bl)    # one-time parameter repack

    y = cnnseq1_forward(x2d, slab)
    y = jax.block_until_ready(y)

    y_ref = reference_np(x2d, w1, b1, w2, b2, wl_flat, bl)
    assert y.shape == (BATCH,)
    np.testing.assert_allclose(np.asarray(y), y_ref, rtol=2e-3, atol=2e-3)
    print("KERNEL_OK")
</pallas_src>

<mosaic_0001>
module attributes {stable_mosaic.version = 11 : i64} {
  func.func @cnnseq1_kernel(%arg0: memref<16x384xf32, #tpu.memory_space<vmem>>, %arg1: memref<40x896xf32, #tpu.memory_space<vmem>>, %arg2: memref<2x1xf32, #tpu.memory_space<vmem>>) attributes {dimension_semantics = [], scalar_prefetch = 0 : i64, scratch_operands = 0 : i64, tpu.core_type = #tpu.core_type<tc>} {
    %c0 = arith.constant 0 : index
    %c0_0 = arith.constant 0 : index
    %0 = vector.load %arg0[%c0, %c0_0] : memref<16x384xf32, #tpu.memory_space<vmem>>, vector<16x384xf32>
    %c0_1 = arith.constant 0 : index
    %c0_2 = arith.constant 0 : index
    %1 = vector.load %arg1[%c0_1, %c0_2] : memref<40x896xf32, #tpu.memory_space<vmem>>, vector<40x896xf32>
    %2 = vector.extract_strided_slice %1 {offsets = [0, 0], sizes = [16, 3], strides = [1, 1]} : vector<40x896xf32> to vector<16x3xf32>
    %3 = vector.extract_strided_slice %1 {offsets = [16, 0], sizes = [16, 1], strides = [1, 1]} : vector<40x896xf32> to vector<16x1xf32>
    %4 = vector.extract_strided_slice %1 {offsets = [0, 128], sizes = [16, 1], strides = [1, 1]} : vector<40x896xf32> to vector<16x1xf32>
    %5 = vector.extract_strided_slice %1 {offsets = [16, 128], sizes = [16, 9], strides = [1, 1]} : vector<40x896xf32> to vector<16x9xf32>
    %6 = vector.extract_strided_slice %1 {offsets = [0, 256], sizes = [16, 16], strides = [1, 1]} : vector<40x896xf32> to vector<16x16xf32>
    %7 = vector.extract_strided_slice %1 {offsets = [16, 256], sizes = [16, 16], strides = [1, 1]} : vector<40x896xf32> to vector<16x16xf32>
    %8 = vector.extract_strided_slice %1 {offsets = [0, 384], sizes = [16, 16], strides = [1, 1]} : vector<40x896xf32> to vector<16x16xf32>
    %9 = vector.extract_strided_slice %1 {offsets = [16, 384], sizes = [2, 16], strides = [1, 1]} : vector<40x896xf32> to vector<2x16xf32>
    %10 = vector.extract_strided_slice %1 {offsets = [24, 384], sizes = [2, 1], strides = [1, 1]} : vector<40x896xf32> to vector<2x1xf32>
    %11 = vector.extract_strided_slice %1 {offsets = [0, 512], sizes = [35, 384], strides = [1, 1]} : vector<40x896xf32> to vector<35x384xf32>
    %12 = vector.extract_strided_slice %2 {offsets = [0, 0], sizes = [16, 1], strides = [1, 1]} : vector<16x3xf32> to vector<16x1xf32>
    %13 = vector.extract_strided_slice %0 {offsets = [0, 0], sizes = [16, 35], strides = [1, 1]} : vector<16x384xf32> to vector<16x35xf32>
    %14 = vector.broadcast %12 : vector<16x1xf32> to vector<16x35xf32>
    %15 = arith.mulf %14, %13 : vector<16x35xf32>
    %16 = vector.extract_strided_slice %2 {offsets = [0, 1], sizes = [16, 1], strides = [1, 1]} : vector<16x3xf32> to vector<16x1xf32>
    %17 = vector.extract_strided_slice %0 {offsets = [0, 128], sizes = [16, 35], strides = [1, 1]} : vector<16x384xf32> to vector<16x35xf32>
    %18 = vector.broadcast %16 : vector<16x1xf32> to vector<16x35xf32>
    %19 = arith.mulf %18, %17 : vector<16x35xf32>
    %20 = arith.addf %15, %19 : vector<16x35xf32>
    %21 = vector.extract_strided_slice %2 {offsets = [0, 2], sizes = [16, 1], strides = [1, 1]} : vector<16x3xf32> to vector<16x1xf32>
    %22 = vector.extract_strided_slice %0 {offsets = [0, 256], sizes = [16, 35], strides = [1, 1]} : vector<16x384xf32> to vector<16x35xf32>
    %23 = vector.broadcast %21 : vector<16x1xf32> to vector<16x35xf32>
    %24 = arith.mulf %23, %22 : vector<16x35xf32>
    %25 = arith.addf %20, %24 : vector<16x35xf32>
    %26 = vector.broadcast %3 : vector<16x1xf32> to vector<16x35xf32>
    %27 = arith.addf %25, %26 : vector<16x35xf32>
    %cst = arith.constant 0.000000e+00 : f32
    %28 = vector.broadcast %cst : f32 to vector<16x35xf32>
    %29 = arith.maximumf %27, %28 : vector<16x35xf32>
    %cst_3 = arith.constant dense<0.000000e+00> : vector<16x384xf32>
    %30 = tpu.matmul %29, %11, %cst_3 {dimension_numbers = #tpu.dot_dimension_numbers<[1], [0], [0], [1], [0, 0, 1, 1], [], []>} : vector<16x35xf32>, vector<35x384xf32>, vector<16x384xf32> -> vector<16x384xf32>
    %31 = vector.extract_strided_slice %30 {offsets = [0, 0], sizes = [16, 9], strides = [1, 1]} : vector<16x384xf32> to vector<16x9xf32>
    %cst_4 = arith.constant dense<0.000000e+00> : vector<16x9xf32>
    %32 = tpu.matmul %6, %31, %cst_4 {dimension_numbers = #tpu.dot_dimension_numbers<[1], [0], [0], [1], [0, 0, 1, 1], [], []>} : vector<16x16xf32>, vector<16x9xf32>, vector<16x9xf32> -> vector<16x9xf32>
    %33 = vector.extract_strided_slice %30 {offsets = [0, 128], sizes = [16, 9], strides = [1, 1]} : vector<16x384xf32> to vector<16x9xf32>
    %cst_5 = arith.constant dense<0.000000e+00> : vector<16x9xf32>
    %34 = tpu.matmul %7, %33, %cst_5 {dimension_numbers = #tpu.dot_dimension_numbers<[1], [0], [0], [1], [0, 0, 1, 1], [], []>} : vector<16x16xf32>, vector<16x9xf32>, vector<16x9xf32> -> vector<16x9xf32>
    %35 = arith.addf %32, %34 : vector<16x9xf32>
    %36 = vector.extract_strided_slice %30 {offsets = [0, 256], sizes = [16, 9], strides = [1, 1]} : vector<16x384xf32> to vector<16x9xf32>
    %cst_6 = arith.constant dense<0.000000e+00> : vector<16x9xf32>
    %37 = tpu.matmul %8, %36, %cst_6 {dimension_numbers = #tpu.dot_dimension_numbers<[1], [0], [0], [1], [0, 0, 1, 1], [], []>} : vector<16x16xf32>, vector<16x9xf32>, vector<16x9xf32> -> vector<16x9xf32>
    %38 = arith.addf %35, %37 : vector<16x9xf32>
    %39 = vector.broadcast %4 : vector<16x1xf32> to vector<16x9xf32>
    %40 = arith.addf %38, %39 : vector<16x9xf32>
    %cst_7 = arith.constant 0.000000e+00 : f32
    %41 = vector.broadcast %cst_7 : f32 to vector<16x9xf32>
    %42 = arith.maximumf %40, %41 : vector<16x9xf32>
    %43 = arith.mulf %42, %5 : vector<16x9xf32>
    %cst_8 = arith.constant dense<0.000000e+00> : vector<2x9xf32>
    %44 = tpu.matmul %9, %43, %cst_8 {dimension_numbers = #tpu.dot_dimension_numbers<[1], [0], [0], [1], [0, 0, 1, 1], [], []>} : vector<2x16xf32>, vector<16x9xf32>, vector<2x9xf32> -> vector<2x9xf32>
    %cst_9 = arith.constant dense<0.000000e+00> : vector<2xf32>
    %45 = vector.multi_reduction <add>, %44, %cst_9 [1] : vector<2x9xf32> to vector<2xf32>
    %46 = vector.shape_cast %45 : vector<2xf32> to vector<2x1xf32>
    %47 = arith.addf %46, %10 : vector<2x1xf32>
    %cst_10 = arith.constant 0.000000e+00 : f32
    %48 = vector.broadcast %cst_10 : f32 to vector<2x1xf32>
    %49 = arith.subf %48, %47 : vector<2x1xf32>
    %50 = math.exp %49 : vector<2x1xf32>
    %cst_11 = arith.constant 1.000000e+00 : f32
    %51 = vector.broadcast %cst_11 : f32 to vector<2x1xf32>
    %52 = arith.addf %51, %50 : vector<2x1xf32>
    %cst_12 = arith.constant 1.000000e+00 : f32
    %53 = vector.broadcast %cst_12 : f32 to vector<2x1xf32>
    %54 = arith.divf %53, %52 : vector<2x1xf32>
    %c0_13 = arith.constant 0 : index
    %c0_14 = arith.constant 0 : index
    %55 = vector.load %arg2[%c0_13, %c0_14] : memref<2x1xf32, #tpu.memory_space<vmem>>, vector<2x1xf32>
    tpu.vector_store %arg2[%c0_13, %c0_14], %54 {strides = array<i32>} : memref<2x1xf32, #tpu.memory_space<vmem>>, vector<2x1xf32>,
    return
  }
}

</mosaic_0001>

<bundles_post_ra>
// kernel: cnnseq1_forward.1
= control target key start
LH: loop header
LB: loop body
LE: loop exit
PB: predicated region body
PF: predicated region fallthrough
CT: control target
= control target key end

     0   :  { %v713_v0 = vmov 2   ;;  %v714_v1 = vmov 0   ;;  %vm105_vm0 = vcmask 1042432   ;;  %v715_v5 = vmov 1   ;;  %s863_s1 = inlined_call_operand.vmem [shape: f32[40,896], index: 1, kind: input, shape index: {}]   ;;  %s864_s0 = inlined_call_operand.vmem [shape: f32[16,384], index: 0, kind: input, shape index: {}]   ;;  %s865_s2 = inlined_call_operand.vmem [shape: f32[2,1], index: 2, kind: output, shape index: {}]  }
   0x1   :  { %703 = vset.pattern.permute.xlu1 %v713_v0  ;;  %701 = vset.pattern.permute.xlu0 %v714_v1  ;;  %v17_v2 = vld [vmem:[%s863_s1] sm:$0xff]  ;;  %v24_v3 = vld [vmem:[%s863_s1 + $0x38] sm:$0xff]  ;;  %v46_v4 = vld [vmem:[%s863_s1 + $0x108] sm:$0xff]  ;;  %v716_v21 = vmov 0.0   ;;  %vm98_vm1 = vcmask 285696   ;;  %vm267_vm2 = vcmask 130048  }
   0x2   :  { %73 = vperm.xlu1 %703, %v17_v2   ;;  %50 = vperm.xlu0 %701, %v17_v2   ;;  %v45_v6 = vld [vmem:[%s863_s1 + $0x100] sm:$0xff]  ;;  %v43_v7 = vld [vmem:[%s863_s1 + $0xd0] sm:$0xff]  ;;  %v42_v8 = vld [vmem:[%s863_s1 + $0xc8] sm:$0xff]  ;;  %vm717_vm3 = vmmov 0   ;;  %vm602_vm4 = vcmask 66560   ;;  %vm613_vm5 = vcmask 1024  }
   0x3   :  { %619 = vmatprep.subr.msk.mxu0 %vm105_vm0, %v46_v4  ;;  %v47_v9 = vld [vmem:[%s863_s1 + $0x110] sm:$0xff]  ;;  %v36_v10 = vld [vmem:[%s863_s1 + $0x98] sm:$0xff]  ;;  %v29_v13 = vld [vmem:[%s863_s1 + $0x60] sm:$0xff]  ;;  %179 = vmatprep.mubr.f32.mxu0 %v716_v21 }
   0x4   :  { %620 = vmatpush1.msk.msra.mxu0 %vm105_vm0, %v45_v6  ;;  %v35_v11 = vld [vmem:[%s863_s1 + $0x90] sm:$0xff]  ;;  %v44_v12 = vld [vmem:[%s863_s1 + $0xd8] sm:$0xff]  ;;  %655 = vmatprep.subr.msk.mxu1 %vm105_vm0, %v47_v9  ;;  %v22_v16 = vld [vmem:[%s863_s1 + $0x28] sm:$0xff] }
   0x5   :  { %139 = vmatprep.subr.mxu0 %v43_v7  ;;  %v31_v14 = vld [vmem:[%s863_s1 + $0x70] sm:$0xff]  ;;  %656 = vmatpush3.msk.msra.mxu1 %vm105_vm0, %v47_v9  ;;  %v28_v15 = vld [vmem:[%s863_s1 + $0x58] sm:$0xff]  ;;  %v37_v17 = vld [vmem:[%s863_s1 + $0xa0] sm:$0xff] }
   0x6   :  { %704 = vset.pattern.permute.xlu1 %v714_v1  ;;  %702 = vset.pattern.permute.xlu0 %v715_v5  ;;  %v21_v18 = vld [vmem:[%s863_s1 + $0x20] sm:$0xff]  ;;  %v38_v19 = vld [vmem:[%s863_s1 + $0xa8] sm:$0xff]  ;;  %v23_v22 = vld [vmem:[%s863_s1 + $0x30] sm:$0xff] }
   0x7   :  { %55 = vperm.xlu1 %704, %v24_v3   ;;  %61 = vperm.xlu0 %702, %v17_v2   ;;  %v30_v20 = vld [vmem:[%s863_s1 + $0x68] sm:$0xff]  ;;  %v11_v26 = vld [vmem:[%s864_s0] sm:$0xff]  ;;  %v13_v33 = vld [vmem:[%s864_s0 + $0x10] sm:$0xff] }
   0x8   :  { %140 = vmatpush1.msra.mxu0 %v42_v8  ;;  %657 = vmatprep.subr.mxu1 %v44_v12  ;;  %v18_v23 = vld [vmem:[%s863_s1 + $0x8] sm:$0xff]  ;;  %v15_v32 = vld [vmem:[%s864_s0 + $0x20] sm:$0xff]  ;;  %v14_v34 = vld [vmem:[%s864_s0 + $0x18] sm:$0xff] }
   0x9   :  { %141 = vmatprep.subr.mxu0 %v36_v10  ;;  %658 = vmatpush3.msra.mxu1 %v44_v12  ;;  %v12_v27 = vld [vmem:[%s864_s0 + $0x8] sm:$0xff]  ;;  %v33_v52 = vld [vmem:[%s863_s1 + $0x80] sm:$0xff]  ;;  %v19_v53 = vld [vmem:[%s863_s1 + $0x10] sm:$0xff] }
   0xa   :  { %142 = vmatpush1.msra.mxu0 %v35_v11  ;;  %659 = vmatprep.subr.mxu1 %v37_v17  ;;  %v16_v39 = vld [vmem:[%s864_s0 + $0x28] sm:$0xff]  ;;  %v25_v54 = vld [vmem:[%s863_s1 + $0x40] sm:$0xff]  ;;  %v40_v61 = vld [vmem:[%s863_s1 + $0xb8] sm:$0xff] }
   0xb   :  { %705 = vset.pattern.permute.xlu1 %v715_v5  ;;  %706 = vset.pattern.permute.xlu0 %v713_v0  ;;  %v26_v59 = vld [vmem:[%s863_s1 + $0x48] sm:$0xff]  ;;  %v20_v62 = vld [vmem:[%s863_s1 + $0x18] sm:$0xff]  ;;  %v27_v0 = vld [vmem:[%s863_s1 + $0x50] sm:$0xff] }
   0xc   :  { %65 = vperm.xlu1 %705, %v24_v3   ;;  %77 = vperm.xlu0 %706, %v24_v3  }
   0xd   :  { %143 = vmatprep.subr.mxu0 %v29_v13  ;;  %660 = vmatpush3.msra.mxu1 %v37_v17  ;;  %v32_v17 = vld [vmem:[%s863_s1 + $0x78] sm:$0xff] }
   0xe   :  { %144 = vmatpush1.msra.mxu0 %v28_v15  ;;  %661 = vmatprep.subr.mxu1 %v30_v20 }
   0xf   :  { %145 = vmatprep.subr.mxu0 %v22_v16  ;;  %662 = vmatpush3.msra.mxu1 %v30_v20 }
  0x10   :  { %707 = vset.pattern.permute.xlu1 %v714_v1  ;;  %146 = vmatpush1.msra.mxu0 %v21_v18 }
  0x11   :  { %86 = vperm.xlu1 %707, %v31_v14   ;;  %708 = vset.pattern.permute.xlu0 %v714_v1  ;;  %v39_v14 = vld [vmem:[%s863_s1 + $0xb0] sm:$0xff] }
  0x12   :  { %663 = vmatprep.subr.mxu1 %v23_v22  ;;  %520 = vperm.xlu0 %708, %v25_v54  }
  0x13   :  { %664 = vmatpush3.msra.mxu1 %v23_v22  ;;  %v34_v22 = vld [vmem:[%s863_s1 + $0x88] sm:$0xff] }
  0x15   :  { %91 = vperm.xlu1 %707, %v38_v19  }
  0x19   :  { %515 = vperm.xlu1 %707, %v18_v23  }
  0x7d   :  { %v74_v24 = vpop.permute.xlu1 %73  ;;  %v51_v25 = vpop.permute.xlu0 %50 }
  0x7e   :  { %v58_v30 = vmul.f32 %v51_v25, %v11_v26  ;;  %v80_v40 = vmul.f32 %v74_v24, %v13_v33  ;;  %v41_v26 = vld [vmem:[%s863_s1 + $0xc0] sm:$0xff] }
  0x82   :  { %v56_v28 = vpop.permute.xlu1 %55  ;;  %v62_v29 = vpop.permute.xlu0 %61 }
  0x83   :  { %v68_v31 = vmul.f32 %v62_v29, %v12_v27  ;;  %v59_v41 = vmul.f32 %v56_v28, %v14_v34 }
  0x85   :  { %v70_v35 = vadd.f32 %v68_v31, %v58_v30 }
  0x87   :  { %v66_v36 = vpop.permute.xlu1 %65  ;;  %v78_v38 = vpop.permute.xlu0 %77  ;;  %v82_v44 = vadd.f32 %v80_v40, %v70_v35 }
  0x88   :  { %v69_v37 = vmul.f32 %v66_v36, %v15_v32  ;;  %v81_v43 = vmul.f32 %v78_v38, %v16_v39 }
  0x8a   :  { %v71_v42 = vadd.f32 %v69_v37, %v59_v41 }
  0x8c   :  { %v87_v45 = vpop.permute.xlu1 %86  ;;  %v83_v48 = vadd.f32 %v81_v43, %v71_v42 }
  0x8d   :  { %v94_v46 = vadd.f32 %v87_v45, %v82_v44  ;;  %v521_v7 = vpop.permute.xlu0 %520 }
  0x8f   :  { %v96_v47 = vmax.f32 %v94_v46, 0.0 }
  0x90   :  { %v92_v49 = vpop.permute.xlu1 %91 }
  0x91   :  { %v95_v50 = vadd.f32 %v92_v49, %v83_v48  ;;  %621 = vmatmul.mubr.msk.f32.vlgmr.msra.gmra.mxu0 %vm98_vm1, %v96_v47  ;;  %665 = vmatprep.mubr.msk.f32.mxu1 %vm98_vm1, %v96_v47 }
  0x92   :  { %185 = vmatprep.mubr.f32.mxu0 %v716_v21 }
  0x93   :  { %v97_v51 = vmax.f32 %v95_v50, 0.0 }
  0x94   :  { %v516_v13 = vpop.permute.xlu1 %515 }
  0x95   :  { %622 = vmatmul.mubr.msk.f32.gmra.mxu0 %vm98_vm1, %v97_v51  ;;  %666 = vmatmul.mubr.msk.f32.vlgmr.msra.gmra.mxu1 %vm98_vm1, %v97_v51 }
  0x96   :  { %672 = vmatprep.mubr.msk.f32.mxu1 %vm267_vm2, %v33_v52  ;;  %679 = vmatprep.mubr.msk.f32.mxu0 %vm267_vm2, %v19_v53 }
 0x151   :  { %v181_v55 = vpop.f32.mrf.mxu0 }
 0x153   :  { %v183_v56 = vpop.f32.mrf.mxu0 }
 0x155   :  { %v187_v57 = vpop.f32.mrf.mxu0  ;;  %v667_v60 = vpop.f32.mrf.mxu1 }
 0x156   :  { %675 = vmatprep.subr.mxu0 %v187_v57 }
 0x157   :  { %v189_v58 = vpop.f32.mrf.mxu0  ;;  %676 = vmatpush3.msra.mxu0 %v187_v57  ;;  %v258_v63 = vpop.f32.mrf.mxu1 }
 0x158   :  { %668 = vmatprep.subr.mxu1 %v189_v58  ;;  %677 = vmatprep.subr.mxu0 %v181_v55 }
 0x159   :  { %669 = vmatpush3.msra.mxu1 %v189_v58  ;;  %678 = vmatpush3.msra.mxu0 %v181_v55 }
 0x15a   :  { %670 = vmatprep.subr.mxu1 %v183_v56  ;;  %680 = vmatmul.mubr.msk.f32.vlgmr.msra.gmra.mxu0 %vm267_vm2, %v26_v59 }
 0x15b   :  { %671 = vmatpush3.msra.mxu1 %v183_v56  ;;  %689 = vmatprep.subr.mxu0 %v716_v21 }
 0x15c   :  { %673 = vmatmul.mubr.msk.f32.vlgmr.msra.gmra.mxu1 %vm267_vm2, %v40_v61  ;;  %682 = vmatprep.subr.mxu1 %v667_v60 }
 0x15d   :  { %683 = vmatpush3.msra.mxu1 %v667_v60  ;;  %686 = vmatprep.mubr.msk.f32.mxu1 %vm267_vm2, %v20_v62 }
 0x15e   :  { %684 = vmatprep.subr.mxu1 %v258_v63  ;;  %693 = vmatprep.mubr.msk.f32.mxu0 %vm717_vm3, %v716_v21 }
 0x15f   :  { %685 = vmatpush3.msra.mxu1 %v258_v63 }
 0x160   :  { %687 = vmatmul.mubr.msk.f32.vlgmr.msra.gmra.mxu1 %vm267_vm2, %v27_v0 }
 0x21a   :  { %v681_v1 = vpop.f32.mrf.mxu0 }
 0x21c   :  { %v674_v2 = vpop.f32.mrf.mxu1  ;;  %v421_v4 = vpop.f32.mrf.mxu0 }
 0x21d   :  { %v427_v5 = vadd.f32 %v681_v1, %v674_v2 }
 0x21e   :  { %v340_v3 = vpop.f32.mrf.mxu1 }
 0x21f   :  { %v422_v8 = vadd.f32 %v421_v4, %v340_v3 }
 0x220   :  { %v688_v6 = vpop.f32.mrf.mxu1 }
 0x221   :  { %v512_v9 = vadd.f32 %v688_v6, %v427_v5 }
 0x222   :  { %v502_v10 = vpop.f32.mrf.mxu1 }
 0x223   :  { %v524_v11 = vadd.f32 %v521_v7, %v512_v9  ;;  %v511_v12 = vadd.f32 %v502_v10, %v422_v8 }
 0x225   :  { %v526_v15 = vmax.f32 %v524_v11, 0.0  ;;  %v523_v16 = vadd.f32 %v516_v13, %v511_v12 }
 0x227   :  { %v528_v18 = vmul.f32 %v526_v15, %v39_v14  ;;  %v525_v19 = vmax.f32 %v523_v16, 0.0 }
 0x229   :  { %v527_v20 = vmul.f32 %v525_v19, %v32_v17  ;;  %690 = vmatpush3.msra.mxu0 %v528_v18 }
 0x22a   :  { %691 = vmatprep.subr.mxu0 %v716_v21 }
 0x22b   :  { %692 = vmatpush3.msra.mxu0 %v527_v20 }
 0x22c   :  { %694 = vmatmul.mubr.msk.f32.vlgmr.msra.gmra.mxu0 %vm267_vm2, %v34_v22 }
 0x2ec   :  { %v598_v23 = vpop.f32.mrf.mxu0 }
 0x2ed   :  { %v603_v24 = vsel %vm602_vm4, %v598_v23, 0.0 }
 0x2ee   :  { %v695_v25 = vpop.f32.mrf.mxu0  ;;  %604 = vadd.xlane.f32.xlu1 %v603_v24 }
 0x377   :  { %v605_v27 = vpop.xlane.xlu1 %604 }
 0x378   :  { %v606_v28 = vadd.f32 %v605_v27, %v41_v26 }
 0x37a   :  { %v607_v29 = vsub.f32 0.0, %v606_v28 }
 0x37c   :  { %v608_v30 = vmul.f32 1.442695, %v607_v29 }
 0x37e   :  { %709 = vpow2.f32 %v608_v30 }
 0x38b   :  { %v710_v31 = vpop.eup %709 }
 0x38c   :  { %v610_v32 = vadd.f32 1.0, %v710_v31 }
 0x38e   :  { %711 = vrcp.f32 %v610_v32 }
 0x39b   :  { %v712_v21 = vpop.eup %711 }
 0x39c   :  { %614 = vst.msk [vmem:[%s865_s2] sm:$0x3] %vm613_vm5, %v712_v21 }

</bundles_post_ra>
